<compile_context>
chip_gen: v7x
topology: tpu7x:2x2x1
jax: 0.10.0
libtpu: 0.0.40
codegen_flags: <defaults>
</compile_context>

<pallas_src>
import math

import jax
import jax.numpy as jnp
from jax.experimental import pallas as pl
from jax.experimental.pallas import tpu as pltpu

# Hyper-parameters (match CapsLoss.__init__ defaults).
M_PLUS = 0.9
M_MINUS = 0.1
LMBD = 0.5
RECON_LMBD = 0.0005

_LANES = 128
_SUBLANES = 8


def _round_up(x, m):
    return ((x + m - 1) // m) * m


def _cdiv(a, b):
    return (a + b - 1) // b


def _lcm(a, b):
    return a * b // math.gcd(a, b)


def _as_f32(x):
    # Static (trace-time) check: no-op cast is skipped for f32 inputs.
    return x if x.dtype == jnp.float32 else x.astype(jnp.float32)


def _caps_loss_kernel(pred_ref, true_ref, recon_ref, img_ref, out_ref):
    """One batch-row chunk: margin loss + weighted reconstruction SSE.

    pred_ref : (D, rows*C)   capsule dim on sublanes, (row, capsule) on lanes
    true_ref : (1, rows*C)   targets, same lane order as pred
    recon_ref / img_ref : (rows, IMG)
    out_ref  : (1, 8, 128)   lane-dense tile filled with this chunk's partial
    """
    p = _as_f32(pred_ref[...])                        # (D, rows*C)
    # ||pred||^2 per capsule: axis-0 reduce over D -- no lane padding, no
    # cross-lane work, no MXU precision concerns.
    len_sq = jnp.sum(p * p, axis=0, keepdims=True)    # (1, rows*C)
    lengths = jnp.sqrt(len_sq)

    t = _as_f32(true_ref[...])                        # (1, rows*C)
    pos = jnp.square(jnp.maximum(M_PLUS - lengths, 0.0))
    neg = jnp.square(jnp.maximum(lengths - M_MINUS, 0.0))
    margin = jnp.sum(t * pos + LMBD * (1.0 - t) * neg)

    # Reconstruction SSE: accumulate over rows (sublanes) first so every lane
    # keeps its own f32 partial, then a single cross-lane reduce.
    diff = _as_f32(recon_ref[...]) - _as_f32(img_ref[...])
    sse = jnp.sum(jnp.sum(diff * diff, axis=0, keepdims=True))

    partial = margin + jnp.float32(RECON_LMBD) * sse
    # Lane-dense (1, 8, 128) tile; the wrapper reads element [0, 0].
    out_ref[...] = jnp.full(out_ref.shape, partial, dtype=out_ref.dtype)


def _padded_per_row_bytes(caps, dim, img_cols, pred_dt, true_dt, img_dt):
    """Double-buffered VMEM bytes per batch row, including layout padding."""
    pred_b = caps * dim * jnp.dtype(pred_dt).itemsize            # (D, rows*C): lane-dense
    true_b = _SUBLANES * caps * jnp.dtype(true_dt).itemsize      # (1, rows*C): 8-sublane pad
    img_b = 2 * _round_up(img_cols, _LANES) * jnp.dtype(img_dt).itemsize
    return 2 * (pred_b + true_b + img_b)                         # x2 double-buffering


def _plan_tiling(batch, caps, per_row_bytes, budget_bytes):
    """Pick (rows_per_chunk, padded_batch, num_chunks).

    Multi-chunk row blocks must satisfy both the 8-sublane constraint of the
    (rows, IMG) image blocks and the 128-lane constraint of the (D, rows*C)
    pred block; a single full-batch chunk has no such constraint.
    """
    granule = _lcm(8, 128 // math.gcd(caps, 128))
    budget_rows = max(granule,
                      (budget_bytes // max(per_row_bytes, 1)) // granule * granule)

    if batch <= budget_rows:
        # Whole batch fits in one chunk.  Split (>=2 chunks) only when it costs
        # no zero-padding, so a v7x megacore can shard the grid.
        if batch >= 2 * granule and batch % granule == 0:
            g = batch // granule
            n = 2
            while g % n:                    # smallest chunk count >= 2 dividing g
                n += 1
            rows = granule * (g // n)
            return rows, batch, _cdiv(batch, rows)
        return batch, batch, 1              # single full-batch chunk, no padding
    rows = budget_rows
    num_chunks = _cdiv(batch, rows)
    return rows, rows * num_chunks, num_chunks


def _vmem_capacity_bytes():
    try:
        info = pltpu.get_tpu_info()
        cap = getattr(info, "vmem_capacity_bytes", None)
        if cap:
            return int(cap)
    except Exception:
        pass
    return 64 * 1024 * 1024                  # conservative fallback (v7x per-TC)


def caps_loss(pred, true, reconstruction, true_image, *,
              target_block_bytes=None, image_buffer_count=2):
    """pred: (B, C, D); true: (B, C); reconstruction / true_image: (B, ...).

    Forward-only CapsLoss.  Accepts f32 or bf16 inputs (narrow dtypes are
    streamed as-is and upcast in-kernel; accumulation is always f32).
    """
    batch, caps, dim = pred.shape
    assert true.shape == (batch, caps)
    recon_flat = reconstruction.reshape(batch, -1)
    img_flat = true_image.reshape(batch, -1)
    img_cols = recon_flat.shape[1]
    assert img_flat.shape[1] == img_cols

    # Generation-aware VMEM budget (v5e/v6e: 128 MiB physical, v7x: 64 MiB).
    vmem_cap = _vmem_capacity_bytes()
    vmem_limit = 96 * 1024 * 1024 if vmem_cap >= 100 * 1024 * 1024 else 32 * 1024 * 1024
    if target_block_bytes is None:
        # Total padded, double-buffered input footprint per grid step.
        target_block_bytes = vmem_limit // 2

    per_row = _padded_per_row_bytes(caps, dim, img_cols,
                                    pred.dtype, true.dtype, recon_flat.dtype)
    rows, padded_batch, num_chunks = _plan_tiling(batch, caps, per_row,
                                                  target_block_bytes)

    # Lane-dense layouts:
    #   pred -> (D, B*C): capsule dim on sublanes, (row, capsule) on lanes.
    #   true -> (1, B*C): matches pred's lane order.
    pred_t = jnp.transpose(pred, (2, 0, 1)).reshape(dim, batch * caps)
    true_f = true.reshape(1, batch * caps)

    pad = padded_batch - batch
    if pad:
        # Zero rows contribute exactly 0: t=0 kills the pos term, lengths=0
        # gives relu(0 - m_minus) = 0, and diff=0 for the SSE.
        pred_t = jnp.pad(pred_t, ((0, 0), (0, pad * caps)))
        true_f = jnp.pad(true_f, ((0, 0), (0, pad * caps)))
        recon_flat = jnp.pad(recon_flat, ((0, pad), (0, 0)))
        img_flat = jnp.pad(img_flat, ((0, pad), (0, 0)))

    img_spec_kwargs = {}
    if image_buffer_count != 2:
        # Optional deeper pipelining of the two dominant image streams.
        img_spec_kwargs["pipeline_mode"] = pl.Buffered(image_buffer_count)

    in_specs = [
        pl.BlockSpec((dim, rows * caps), lambda i: (0, i)),
        pl.BlockSpec((1, rows * caps), lambda i: (0, i)),
        pl.BlockSpec((rows, img_cols), lambda i: (i, 0), **img_spec_kwargs),
        pl.BlockSpec((rows, img_cols), lambda i: (i, 0), **img_spec_kwargs),
    ]

    bytes_accessed = (pred_t.size * pred_t.dtype.itemsize
                      + true_f.size * true_f.dtype.itemsize
                      + recon_flat.size * recon_flat.dtype.itemsize
                      + img_flat.size * img_flat.dtype.itemsize
                      + num_chunks * 8 * 128 * 4)
    cost = pl.CostEstimate(
        flops=3 * padded_batch * img_cols + 8 * padded_batch * caps * dim,
        transcendentals=padded_batch * caps,           # sqrt per capsule
        bytes_accessed=bytes_accessed,
    )

    partial_tiles = pl.pallas_call(
        _caps_loss_kernel,
        out_shape=jax.ShapeDtypeStruct((num_chunks, 8, 128), jnp.float32),
        grid=(num_chunks,),
        in_specs=in_specs,
        out_specs=pl.BlockSpec((1, 8, 128), lambda i: (i, 0, 0)),
        compiler_params=pltpu.CompilerParams(
            dimension_semantics=("parallel",),          # independent chunks
            vmem_limit_bytes=vmem_limit,
        ),
        cost_estimate=cost,
    )(pred_t, true_f, recon_flat, img_flat)

    total = jnp.sum(partial_tiles[:, 0, 0])
    return total / batch                                # divide by ORIGINAL batch


def _caps_loss_ref(pred, true, reconstruction, true_image):
    pred = pred.astype(jnp.float32)
    true = true.astype(jnp.float32)
    recon = reconstruction.astype(jnp.float32).reshape(pred.shape[0], -1)
    img = true_image.astype(jnp.float32).reshape(pred.shape[0], -1)
    lengths = jnp.linalg.norm(pred, axis=-1)
    l_k = true * jnp.square(jnp.maximum(M_PLUS - lengths, 0.0)) + \
        LMBD * (1.0 - true) * jnp.square(jnp.maximum(lengths - M_MINUS, 0.0))
    l_recon = jnp.sum(jnp.square(recon - img))
    return (jnp.sum(l_k) + RECON_LMBD * l_recon) / pred.shape[0]


if __name__ == "__main__":
    key = jax.random.PRNGKey(0)

    def make_inputs(k, b, c, d, img, dtype):
        k1, k2, k3, k4 = jax.random.split(k, 4)
        pred = (jax.random.normal(k1, (b, c, d), dtype=jnp.float32) * 0.3).astype(dtype)
        labels = jax.random.randint(k2, (b,), 0, c)
        true = jax.nn.one_hot(labels, c, dtype=jnp.float32)
        recon = jax.random.uniform(k3, (b, img), dtype=jnp.float32).astype(dtype)
        imgs = jax.random.uniform(k4, (b, img), dtype=jnp.float32).astype(dtype)
        return pred, true, recon, imgs

    def check(name, args, **kw):
        out = jax.block_until_ready(caps_loss(*args, **kw))
        ref = _caps_loss_ref(*args)
        assert jnp.allclose(out, ref, rtol=1e-5, atol=1e-4), (name, out, ref)

    k1, k2, k3 = jax.random.split(key, 3)

    # 1) Default budget, C=10 -> single full-batch chunk (no padding needed).
    check("single_chunk_f32", make_inputs(k1, 16, 10, 16, 256, jnp.float32))

    # 2) Tiny budget, C=16 (row granule 8) -> 2 row-chunks, exercises the grid.
    check("multi_chunk_f32", make_inputs(k2, 16, 16, 8, 128, jnp.float32),
          target_block_bytes=32 * 1024)

    # 3) bf16 streams + batch needing zero-padding (20 -> 24 rows, 3 chunks).
    check("padded_bf16", make_inputs(k3, 20, 16, 8, 128, jnp.bfloat16),
          target_block_bytes=32 * 1024)

    print("KERNEL_OK")
</pallas_src>

<mosaic_0001>
module attributes {stable_mosaic.version = 11 : i64} {
  func.func @_caps_loss_kernel(%arg0: i32, %arg1: memref<16x160xf32, #tpu.memory_space<vmem>>, %arg2: memref<1x160xf32, #tpu.memory_space<vmem>>, %arg3: memref<16x256xf32, #tpu.memory_space<vmem>>, %arg4: memref<16x256xf32, #tpu.memory_space<vmem>>, %arg5: memref<1x8x128xf32, #tpu.memory_space<vmem>>) attributes {dimension_semantics = [#tpu.dimension_semantics<parallel>], iteration_bounds = array<i64: 1>, scalar_prefetch = 0 : i64, scratch_operands = 0 : i64, tpu.core_type = #tpu.core_type<tc>, window_params = [{transform_indices = @transform_0, window_bounds = array<i64: 16, 160>}, {transform_indices = @transform_1, window_bounds = array<i64: 1, 160>}, {transform_indices = @transform_2, window_bounds = array<i64: 16, 256>}, {transform_indices = @transform_3, window_bounds = array<i64: 16, 256>}, {transform_indices = @transform_4, window_bounds = array<i64: 1, 8, 128>}]} {
    %c0 = arith.constant 0 : index
    %c0_0 = arith.constant 0 : index
    %0 = vector.load %arg1[%c0, %c0_0] : memref<16x160xf32, #tpu.memory_space<vmem>>, vector<16x160xf32>
    %1 = arith.mulf %0, %0 : vector<16x160xf32>
    %cst = arith.constant dense<0.000000e+00> : vector<160xf32>
    %2 = vector.multi_reduction <add>, %1, %cst [0] : vector<16x160xf32> to vector<160xf32>
    %3 = vector.shape_cast %2 : vector<160xf32> to vector<1x160xf32>
    %4 = math.sqrt %3 : vector<1x160xf32>
    %c0_1 = arith.constant 0 : index
    %c0_2 = arith.constant 0 : index
    %5 = vector.load %arg2[%c0_1, %c0_2] : memref<1x160xf32, #tpu.memory_space<vmem>>, vector<1x160xf32>
    %cst_3 = arith.constant 0.899999976 : f32
    %6 = vector.broadcast %cst_3 : f32 to vector<1x160xf32>
    %7 = arith.subf %6, %4 : vector<1x160xf32>
    %cst_4 = arith.constant 0.000000e+00 : f32
    %8 = vector.broadcast %cst_4 : f32 to vector<1x160xf32>
    %9 = arith.maximumf %7, %8 : vector<1x160xf32>
    %10 = arith.mulf %9, %9 : vector<1x160xf32>
    %cst_5 = arith.constant 1.000000e-01 : f32
    %11 = vector.broadcast %cst_5 : f32 to vector<1x160xf32>
    %12 = arith.subf %4, %11 : vector<1x160xf32>
    %cst_6 = arith.constant 0.000000e+00 : f32
    %13 = vector.broadcast %cst_6 : f32 to vector<1x160xf32>
    %14 = arith.maximumf %12, %13 : vector<1x160xf32>
    %15 = arith.mulf %14, %14 : vector<1x160xf32>
    %16 = arith.mulf %5, %10 : vector<1x160xf32>
    %cst_7 = arith.constant 1.000000e+00 : f32
    %17 = vector.broadcast %cst_7 : f32 to vector<1x160xf32>
    %18 = arith.subf %17, %5 : vector<1x160xf32>
    %cst_8 = arith.constant 5.000000e-01 : f32
    %19 = vector.broadcast %cst_8 : f32 to vector<1x160xf32>
    %20 = arith.mulf %19, %18 : vector<1x160xf32>
    %21 = arith.mulf %20, %15 : vector<1x160xf32>
    %22 = arith.addf %16, %21 : vector<1x160xf32>
    %23 = vector.shape_cast %22 : vector<1x160xf32> to vector<1x1x160xf32>
    %cst_9 = arith.constant dense<0.000000e+00> : vector<1xf32>
    %24 = vector.multi_reduction <add>, %23, %cst_9 [1, 2] : vector<1x1x160xf32> to vector<1xf32>
    %25 = vector.shape_cast %24 : vector<1xf32> to vector<1x1x1xf32>
    %26 = vector.extract %25[0, 0, 0] : f32 from vector<1x1x1xf32>
    %c0_10 = arith.constant 0 : index
    %c0_11 = arith.constant 0 : index
    %27 = vector.load %arg3[%c0_10, %c0_11] : memref<16x256xf32, #tpu.memory_space<vmem>>, vector<16x256xf32>
    %c0_12 = arith.constant 0 : index
    %c0_13 = arith.constant 0 : index
    %28 = vector.load %arg4[%c0_12, %c0_13] : memref<16x256xf32, #tpu.memory_space<vmem>>, vector<16x256xf32>
    %29 = arith.subf %27, %28 : vector<16x256xf32>
    %30 = arith.mulf %29, %29 : vector<16x256xf32>
    %cst_14 = arith.constant dense<0.000000e+00> : vector<256xf32>
    %31 = vector.multi_reduction <add>, %30, %cst_14 [0] : vector<16x256xf32> to vector<256xf32>
    %32 = vector.shape_cast %31 : vector<256xf32> to vector<1x256xf32>
    %33 = vector.shape_cast %32 : vector<1x256xf32> to vector<1x1x256xf32>
    %cst_15 = arith.constant dense<0.000000e+00> : vector<1xf32>
    %34 = vector.multi_reduction <add>, %33, %cst_15 [1, 2] : vector<1x1x256xf32> to vector<1xf32>
    %35 = vector.shape_cast %34 : vector<1xf32> to vector<1x1x1xf32>
    %36 = vector.extract %35[0, 0, 0] : f32 from vector<1x1x1xf32>
    %cst_16 = arith.constant 5.000000e-04 : f32
    %37 = arith.mulf %cst_16, %36 : f32
    %38 = arith.addf %26, %37 : f32
    %39 = vector.broadcast %38 : f32 to vector<1x8x128xf32>
    %c0_17 = arith.constant 0 : index
    %c0_18 = arith.constant 0 : index
    %c0_19 = arith.constant 0 : index
    %40 = vector.load %arg5[%c0_17, %c0_18, %c0_19] : memref<1x8x128xf32, #tpu.memory_space<vmem>>, vector<1x8x128xf32>
    tpu.vector_store %arg5[%c0_17, %c0_18, %c0_19], %39 {strides = array<i32>} : memref<1x8x128xf32, #tpu.memory_space<vmem>>, vector<1x8x128xf32>,
    return
  }
  func.func @transform_0(%arg0: i32) -> (i32, i32) {
    %c0_i32 = arith.constant 0 : i32
    %c0_i32_0 = arith.constant 0 : i32
    return %c0_i32, %arg0 : i32, i32
  }
  func.func @transform_1(%arg0: i32) -> (i32, i32) {
    %c0_i32 = arith.constant 0 : i32
    %c0_i32_0 = arith.constant 0 : i32
    return %c0_i32, %arg0 : i32, i32
  }
  func.func @transform_2(%arg0: i32) -> (i32, i32) {
    %c0_i32 = arith.constant 0 : i32
    %c0_i32_0 = arith.constant 0 : i32
    return %arg0, %c0_i32 : i32, i32
  }
  func.func @transform_3(%arg0: i32) -> (i32, i32) {
    %c0_i32 = arith.constant 0 : i32
    %c0_i32_0 = arith.constant 0 : i32
    return %arg0, %c0_i32 : i32, i32
  }
  func.func @transform_4(%arg0: i32) -> (i32, i32, i32) {
    %c0_i32 = arith.constant 0 : i32
    %c0_i32_0 = arith.constant 0 : i32
    %c0_i32_1 = arith.constant 0 : i32
    return %arg0, %c0_i32, %c0_i32_0 : i32, i32, i32
  }
}

</mosaic_0001>

<bundles_post_ra>
// kernel: tpu_custom_call.1
= control target key start
LH: loop header
LB: loop body
LE: loop exit
PB: predicated region body
PF: predicated region fallthrough
CT: control target
= control target key end

     0   :  { %9 = vsyncpa [#allocation3], 0  ;;  %s449_s0 = inlined_call_operand.hbm [shape: f32[16,160], index: 0, kind: input, shape index: {}]   ;;  %s450_s1 = inlined_call_operand.vmem [shape: f32[1,160], index: 1, kind: input, shape index: {}]   ;;  %s451_s2 = inlined_call_operand.hbm [shape: f32[16,256], index: 2, kind: input, shape index: {}]   ;;  %s452_s3 = inlined_call_operand.hbm [shape: f32[16,256], index: 3, kind: input, shape index: {}]   ;;  %s453_s4 = inlined_call_operand.hbm [shape: f32[1,8,128], index: 4, kind: output, shape index: {}]  }
   0x1   :  { %10 = vsyncpa [#allocation6], 0 }
   0x2   :  { %11 = vsyncpa [#allocation4], 0  ;;  %s350_s15 = smov [#allocation5]   ;;  %s351_s17 = smov [#allocation2]  }
   0x3   :  { %s31_s16 = sshll.u32 %s350_s15, 4  ;;  %s17_s18 = sshll.u32 %s351_s17, 4  ;;  %s32_s16 = int_to_ptr.vmem [resolvable:$true] %s31_s16  ;;  %s382_s18 = int_to_ptr.vmem [resolvable:$true] %s17_s18 }
   0x4   :  { %s256_s21 = scalar_lea.hbm %s451_s2, 512 }
   0x5   :  { %p257_p0 = scmp.ne.s32.totalorder %s451_s2, %s256_s21  ;;  %p260_p1 = scmp.lt.u32.totalorder %s256_s21, %s451_s2 }
   0x7   :  { %p262_p2 = pnand %p260_p1, %p257_p0 }
   0x9   :  { %265 = shalt.err (!%p262_p2)
}
   0xa   :  { %s266_s26 = scalar_lea.vmem %s32_s16, 512  ;;  %p271_p4 = scmp.lt.s32.totalorder %s32_s16, %s32_s16 }
   0xb   :  { %p267_p3 = scmp.ne.s32.totalorder %s32_s16, %s266_s26  ;;  %p272_p5 = scmp.lt.s32.totalorder %s266_s26, %s266_s26 }
   0xd   :  { %p273_p6 = por %p272_p5, %p271_p4 }
   0xf   :  { %p274_p7 = pnand %p273_p6, %p267_p3 }
  0x11   :  { %277 = shalt.err (!%p274_p7)
}
  0x12   :  { %s352_s27 = smov 256   ;;  %s353_s28 = smov 16  }
  0x13   :  { %37 = dma.hbm_to_vmem [thread:$0]  %s451_s2, 512, %s32_s16, [#allocation6], %s352_s27, %s352_s27, %s353_s28  }
  0x14   :  { %s278_s7 = scalar_lea.hbm %s449_s0, 512 }
  0x15   :  { %p279_p8 = scmp.ne.s32.totalorder %s449_s0, %s278_s7  ;;  %p282_p9 = scmp.lt.u32.totalorder %s278_s7, %s449_s0 }
  0x17   :  { %p284_p10 = pnand %p282_p9, %p279_p8 }
  0x19   :  { %287 = shalt.err (!%p284_p10)
}
  0x1a   :  { %s288_s12 = scalar_lea.vmem %s382_s18, 512  ;;  %p293_p12 = scmp.lt.s32.totalorder %s382_s18, %s382_s18 }
  0x1b   :  { %p289_p11 = scmp.ne.s32.totalorder %s382_s18, %s288_s12  ;;  %p294_p13 = scmp.lt.s32.totalorder %s288_s12, %s288_s12 }
  0x1d   :  { %p295_p0 = por %p294_p13, %p293_p12 }
  0x1f   :  { %p296_p1 = pnand %p295_p0, %p289_p11 }
  0x21   :  { %299 = shalt.err (!%p296_p1)
}
  0x22   :  { %23 = dma.hbm_to_vmem [thread:$0]  %s449_s0, 512, %s382_s18, [#allocation3], %s352_s27, %s352_s27, %s353_s28  }
  0x23   :  { %s354_s14 = smov [#allocation7]   ;;  %s300_s19 = scalar_lea.hbm %s452_s3, 512 }
  0x24   :  { %s43_s15 = sshll.u32 %s354_s14, 4  ;;  %p301_p2 = scmp.ne.s32.totalorder %s452_s3, %s300_s19  ;;  %s44_s15 = int_to_ptr.vmem [resolvable:$true] %s43_s15 }
  0x25   :  { %p304_p3 = scmp.lt.u32.totalorder %s300_s19, %s452_s3 }
  0x27   :  { %p306_p4 = pnand %p304_p3, %p301_p2 }
  0x29   :  { %309 = shalt.err (!%p306_p4)
}
  0x2a   :  { %s310_s24 = scalar_lea.vmem %s44_s15, 512  ;;  %p315_p6 = scmp.lt.s32.totalorder %s44_s15, %s44_s15 }
  0x2b   :  { %p311_p5 = scmp.ne.s32.totalorder %s44_s15, %s310_s24  ;;  %p316_p7 = scmp.lt.s32.totalorder %s310_s24, %s310_s24 }
  0x2d   :  { %p317_p8 = por %p316_p7, %p315_p6 }
  0x2f   :  { %p318_p9 = pnand %p317_p8, %p311_p5 }
  0x31   :  { %321 = shalt.err (!%p318_p9)
}
  0x32   :  { %49 = dma.hbm_to_vmem [thread:$0]  %s452_s3, 512, %s44_s15, [#allocation6], %s352_s27, %s352_s27, %s353_s28  }
  0x33   :  { %344 = dma.done.wait [#allocation3], 512  }
  0x34   :  { %345 = vsyncadd [#allocation3], 4294966784 }
  0x35   :  { %346 = dma.done.wait [#allocation6], 1024  }
  0x36   :  { %347 = vsyncadd [#allocation6], 4294966272  ;;  %v59_v0 = vld [vmem:[#allocation2] sm:$0xff]  ;;  %v60_v1 = vld [vmem:[#allocation2 + $0x8] sm:$0xff]  ;;  %vm74_vm0 = vcmask 261120   ;;  %v117_v51 = vlaneseq  ;;  %vm163_vm5 = vcmask 1040384  }
  0x37   :  { %v61_v2 = vld [vmem:[#allocation2 + $0x10] sm:$0xff]  ;;  %v62_v3 = vld [vmem:[#allocation2 + $0x18] sm:$0xff]  ;;  %v63_v4 = vmul.f32 %v59_v0, %v59_v0  ;;  %v64_v5 = vmul.f32 %v60_v1, %v60_v1  ;;  %v177_v17 = vld [vmem:[#allocation5] sm:$0xff]  ;;  %v355_v49 = vmov 1966171168   ;;  %vm165_vm6 = vcmask 253952  }
  0x38   :  { %v65_v6 = vmul.f32 %v61_v2, %v61_v2  ;;  %v66_v7 = vmul.f32 %v62_v3, %v62_v3  ;;  %v178_v18 = vld [vmem:[#allocation5 + $0x8] sm:$0xff]  ;;  %v179_v21 = vld [vmem:[#allocation5 + $0x10] sm:$0xff]  ;;  %v181_v22 = vld [vmem:[#allocation7] sm:$0xff]  ;;  %v115_v50 = vunpack.c.l.s4 %v355_v49  ;;  %v118_v62 = vshrl.u32 %v117_v51, 7  ;;  %s356_s28 = smov [#allocation8]  }
  0x39   :  { %v75_v9 = vsel %vm74_vm0, %v64_v5, 0.0  ;;  %v182_v23 = vld [vmem:[#allocation7 + $0x8] sm:$0xff]  ;;  %v180_v24 = vld [vmem:[#allocation5 + $0x18] sm:$0xff]  ;;  %v183_v25 = vld [vmem:[#allocation7 + $0x10] sm:$0xff]  ;;  %v185_v29 = vsub.f32 %v177_v17, %v181_v22  ;;  %s229_s29 = sshll.u32 %s356_s28, 4  ;;  %s230_s29 = int_to_ptr.vmem [resolvable:$true] %s229_s29 }
  0x3a   :  { %v67_v8 = vadd.f32 %v65_v6, %v63_v4  ;;  %v76_v10 = vsel %vm74_vm0, %v66_v7, 0.0  ;;  %v184_v26 = vld [vmem:[#allocation7 + $0x18] sm:$0xff]  ;;  %v186_v30 = vsub.f32 %v178_v18, %v182_v23  ;;  %v187_v33 = vsub.f32 %v179_v21, %v183_v25  ;;  %v98_v3 = vld [vmem:[%s450_s1] sm:$0x3]  ;;  %s322_s5 = scalar_lea.vmem %s230_s29, 128  ;;  %p327_p11 = scmp.lt.s32.totalorder %s230_s29, %s230_s29 }
  0x3b   :  { %v77_v12 = vadd.f32 %v76_v10, %v75_v9  ;;  %v188_v34 = vsub.f32 %v180_v24, %v184_v26  ;;  %v189_v36 = vmul.f32 %v185_v29, %v185_v29  ;;  %v116_v61 = vunpack.c.0.s8 %v115_v50  ;;  %p323_p10 = scmp.ne.s32.totalorder %s230_s29, %s322_s5  ;;  %p328_p12 = scmp.lt.s32.totalorder %s322_s5, %s322_s5 }
  0x3c   :  { %v68_v11 = vrot.slane %v67_v8, 4  ;;  %v190_v37 = vmul.f32 %v186_v30, %v186_v30  ;;  %v191_v38 = vmul.f32 %v187_v33, %v187_v33 }
  0x3d   :  { %v78_v14 = vrot.slane %v77_v12, 4  ;;  %v192_v39 = vmul.f32 %v188_v34, %v188_v34  ;;  %p329_p13 = por %p328_p12, %p327_p11 }
  0x3e   :  { %v69_v13 = vadd.f32 %v68_v11, %v67_v8  ;;  %v193_v40 = vadd.f32 %v191_v38, %v189_v36 }
  0x3f   :  { %v79_v16 = vadd.f32 %v78_v14, %v77_v12  ;;  %v200_v41 = vadd.f32 %v192_v39, %v190_v37  ;;  %v119_v12 = vsub.s32 %v116_v61, %v118_v62  ;;  %p330_p0 = pnand %p329_p13, %p323_p10 }
  0x40   :  { %v70_v15 = vrot.slane %v69_v13, 2  ;;  %v194_v44 = vrot.slane %v193_v40, 4 }
  0x41   :  { %v80_v20 = vrot.slane %v79_v16, 2  ;;  %v201_v45 = vrot.slane %v200_v41, 4 }
  0x42   :  { %v71_v19 = vadd.f32 %v70_v15, %v69_v13  ;;  %v195_v55 = vadd.f32 %v194_v44, %v193_v40  ;;  %v130_v13 = vsub.f32 1.0, %v98_v3 }
  0x43   :  { %v81_v28 = vadd.f32 %v80_v20, %v79_v16  ;;  %v202_v56 = vadd.f32 %v201_v45, %v200_v41 }
  0x44   :  { %v72_v27 = vrot.slane %v71_v19, 1  ;;  %v196_v4 = vrot.slane %v195_v55, 2 }
  0x45   :  { %v82_v32 = vrot.slane %v81_v28, 1  ;;  %v203_v5 = vrot.slane %v202_v56, 2 }
  0x46   :  { %v73_v31 = vadd.f32 %v72_v27, %v71_v19  ;;  %v197_v16 = vadd.f32 %v196_v4, %v195_v55  ;;  %v131_v19 = vmul.f32 0.5, %v130_v13  ;;  %v155_v27 = vsub.s32 0, %v118_v62 }
  0x47   :  { %v83_v35 = vadd.f32 %v82_v32, %v81_v28  ;;  %v204_v17 = vadd.f32 %v203_v5, %v202_v56  ;;  %v159_v28 = vsub.s32 1, %v118_v62 }
  0x48   :  { %252 = vrsqrt.f32 %v73_v31  ;;  %vm86_vm1 = vcmp.eq.f32.partialorder %v73_v31, inf  ;;  %v89_v43 = vand.u32 2147483648, %v73_v31  ;;  %vm88_vm2 = vcmp.eq.f32.partialorder %v73_v31, 0.0 }
  0x49   :  { %254 = vrsqrt.f32 %v83_v35  ;;  %vm93_vm3 = vcmp.eq.f32.partialorder %v83_v35, inf  ;;  %v96_v48 = vand.u32 2147483648, %v83_v35  ;;  %vm95_vm4 = vcmp.eq.f32.partialorder %v83_v35, 0.0 }
  0x4a   :  { %v198_v23 = vrot.slane %v197_v16, 1  ;;  %v205_v24 = vrot.slane %v204_v17, 1 }
  0x4c   :  { %v199_v30 = vadd.f32 %v198_v23, %v197_v16 }
  0x4e   :  { %v207_v36 = vsel %vm163_vm5, %v199_v30, 0.0 }
  0x52   :  { %v253_v42 = vpop.eup %252 }
  0x53   :  { %v85_v46 = vmul.f32 %v253_v42, %v73_v31  ;;  %v255_v47 = vpop.eup %254 }
  0x54   :  { %v92_v53 = vmul.f32 %v255_v47, %v83_v35 }
  0x55   :  { %v87_v52 = vsel %vm86_vm1, %v73_v31, %v85_v46  ;;  %v206_v31 = vadd.f32 %v205_v24, %v204_v17 }
  0x56   :  { %v90_v54 = vsel %vm88_vm2, %v89_v43, %v87_v52  ;;  %v94_v57 = vsel %vm93_vm3, %v83_v35, %v92_v53 }
  0x57   :  { %v99_v58 = vsub.f32 0.9, %v90_v54  ;;  %v239_v59 = vadd.f32 -0.1, %v90_v54  ;;  %v97_v60 = vsel %vm95_vm4, %v96_v48, %v94_v57  ;;  %v208_v37 = vsel %vm163_vm5, %v206_v31, 0.0 }
  0x58   :  { %v100_v63 = vsub.f32 0.9, %v97_v60  ;;  %v240_v1 = vadd.f32 -0.1, %v97_v60  ;;  %v209_v39 = vadd.f32 %v208_v37, %v207_v36 }
  0x59   :  { %v101_v0 = vmax.f32 %v99_v58, 0.0  ;;  %v107_v2 = vmax.f32 %v239_v59, 0.0 }
  0x5a   :  { %v102_v6 = vmax.f32 %v100_v63, 0.0  ;;  %v108_v8 = vmax.f32 %v240_v1, 0.0 }
  0x5b   :  { %v103_v7 = vmul.f32 %v101_v0, %v101_v0  ;;  %v109_v9 = vmul.f32 %v107_v2, %v107_v2 }
  0x5c   :  { %v104_v10 = vmul.f32 %v102_v6, %v102_v6  ;;  %v110_v11 = vmul.f32 %v108_v8, %v108_v8 }
  0x5e   :  { %v113_v14 = vcombine.low %v103_v7, %v104_v10  ;;  %v134_v15 = vcombine.low %v109_v9, %v110_v11 }
  0x60   :  { %v120_v18 = vrot.slane %v113_v14, %v119_v12  ;;  %v141_v20 = vrot.slane %v134_v15, %v119_v12 }
  0x62   :  { %v127_v21 = vrot.slane %v120_v18, %v119_v12  ;;  %v148_v22 = vrot.slane %v141_v20, %v119_v12 }
  0x64   :  { %v129_v25 = vmul.f32 %v127_v21, %v98_v3  ;;  %v150_v26 = vmul.f32 %v148_v22, %v131_v19 }
  0x66   :  { %v151_v29 = vadd.f32 %v150_v26, %v129_v25 }
  0x68   :  { %v156_v32 = vrot.slane %v151_v29, %v155_v27  ;;  %v160_v33 = vrot.slane %v151_v29, %v159_v28 }
  0x6a   :  { %v164_v34 = vsel %vm163_vm5, %v156_v32, 0.0  ;;  %v166_v35 = vsel %vm165_vm6, %v160_v33, 0.0 }
  0x6b   :  { %v167_v38 = vadd.f32 %v166_v35, %v164_v34 }
  0x6d   :  { %168 = vadd.xlane.f32.xlu0 %v167_v38 }
  0x71   :  { %210 = vadd.xlane.f32.xlu0 %v209_v39 }
  0xfa   :  { %v169_v40 = vpop.xlane.xlu0 %168 }
  0xfb   :  { %v170_v41 = vrot.slane %v169_v40, 4 }
  0xfd   :  { %v171_v42 = vadd.f32 %v170_v41, %v169_v40 }
  0xfe   :  { %v211_v43 = vpop.xlane.xlu0 %210 }
  0xff   :  { %v172_v44 = vrot.slane %v171_v42, 2  ;;  %v212_v45 = vrot.slane %v211_v43, 4 }
 0x101   :  { %v213_v46 = vadd.f32 %v212_v45, %v211_v43  ;;  %v173_v47 = vadd.f32 %v172_v44, %v171_v42 }
 0x103   :  { %v214_v48 = vrot.slane %v213_v46, 2  ;;  %v174_v49 = vrot.slane %v173_v47, 1 }
 0x105   :  { %v215_v50 = vadd.f32 %v214_v48, %v213_v46  ;;  %v175_v51 = vadd.f32 %v174_v49, %v173_v47 }
 0x107   :  { %241 = vpush %v175_v51  ;;  %v216_v52 = vrot.slane %v215_v50, 1 }
 0x109   :  { %v217_v53 = vadd.f32 %v216_v52, %v215_v50 }
 0x10b   :  { %243 = vpush %v217_v53 }
 0x138   :  { %s242_s1 = spop %241 }
 0x13c   :  { %s244_s26 = spop %243 }
 0x13d   :  { %s219_s27 = smul.f32 0.0005, %s244_s26 }
 0x13f   :  { %s220_s30 = sadd.f32 %s242_s1, %s219_s27 }
 0x141   :  { %v221_v54 = vstv %s220_s30 }
 0x142   :  { %222 = vst [vmem:[#allocation8] sm:$0xff] %v221_v54 }
 0x143   :  { %333 = shalt.err (!%p330_p0)
}
 0x144   :  { %s334_s8 = scalar_lea.hbm %s453_s4, 128 }
 0x145   :  { %p335_p1 = scmp.ne.s32.totalorder %s453_s4, %s334_s8  ;;  %p338_p2 = scmp.lt.u32.totalorder %s334_s8, %s453_s4 }
 0x147   :  { %p340_p3 = pnand %p338_p2, %p335_p1 }
 0x149   :  { %343 = shalt.err (!%p340_p3)
}
 0x14a   :  { %232 = dma.vmem_to_hbm [thread:$0]  %s230_s29, 128, %s453_s4, [#allocation4]  }
 0x14b   :  { %348 = dma.done.wait [#allocation4], 128  }
 0x14c   :  { %349 = vsyncadd [#allocation4], 4294967168 }
 0x14d   :  { %236 = vsyncpa [#allocation3], 1 }
 0x14e   :  { %237 = vsyncpa [#allocation6], 1 }
 0x14f   :  { %238 = vsyncpa [#allocation4], 1 }

</bundles_post_ra>
